<compile_context>
chip_gen: v5e
topology: v5e:2x2
jax: 0.10.0
libtpu: 0.0.40
codegen_flags: <defaults>
</compile_context>

<pallas_src>
import functools

import jax
import jax.numpy as jnp
from jax.experimental import pallas as pl
from jax.experimental.pallas import tpu as pltpu

FEATURES = 1056
HIDDEN = 256
OUT = 32


def _round_up(x, m):
    return ((x + m - 1) // m) * m


def _pick_tile(batch, tb):
    """Batch tile: multiple of 8, and (for B > 8) small enough that the grid
    has >= 2 steps so the parallel axis lands on both v7x TensorCores."""
    if batch <= 8:
        return batch                       # single block == full batch dim
    half = _round_up(pl.cdiv(batch, 2), 8)
    t = min(tb, half)
    return max(8, (t // 8) * 8)


# ----------------------------- kernels --------------------------------------


def _cls_pg_kernel(x_ref, w1_ref, b1_ref, w2_ref, b2_ref, o_ref, *, acts_dtype):
    # First Linear: [tb, 1056] @ [1056, 256] + [1, 256]   (f32 accumulation)
    x = x_ref[...].astype(acts_dtype)
    h = jnp.dot(x, w1_ref[...], preferred_element_type=jnp.float32)
    h = h + b1_ref[...]
    # Second Linear: [tb, 256] @ [256, 32] + [1, 32]
    out = jnp.dot(h.astype(acts_dtype), w2_ref[...],
                  preferred_element_type=jnp.float32)
    out = out + b2_ref[...]
    o_ref[...] = out.astype(o_ref.dtype)


def _cls_pg_fused_kernel(x_ref, w_ref, b_ref, o_ref, *, acts_dtype):
    # Folded module (no nonlinearity): [tb, 1056] @ [1056, 32] + [1, 32]
    x = x_ref[...].astype(acts_dtype)
    out = jnp.dot(x, w_ref[...], preferred_element_type=jnp.float32)
    out = out + b_ref[...]
    o_ref[...] = out.astype(o_ref.dtype)


# ------------------------ one-time param prep -------------------------------


def prepare_params(w1, b1, w2, b2, *, compute_dtype=jnp.float32,
                   fold_layers=False):
    """Hoisted out of the forward: reshape biases, cast weights to the MXU
    operand dtype, optionally fold the two bias-free-gap Linears into one."""
    w1 = jnp.asarray(w1, jnp.float32).reshape(FEATURES, HIDDEN)
    b1 = jnp.asarray(b1, jnp.float32).reshape(1, HIDDEN)
    w2 = jnp.asarray(w2, jnp.float32).reshape(HIDDEN, OUT)
    b2 = jnp.asarray(b2, jnp.float32).reshape(1, OUT)
    if fold_layers:
        w = (w1 @ w2).astype(compute_dtype)          # [1056, 32]
        b = (b1 @ w2 + b2).astype(jnp.float32)       # [1, 32]
        return {"mode": "fused", "w": w, "b": b, "compute_dtype": compute_dtype}
    return {"mode": "two",
            "w1": w1.astype(compute_dtype), "b1": b1,
            "w2": w2.astype(compute_dtype), "b2": b2,
            "compute_dtype": compute_dtype}


# ------------------------------ forward --------------------------------------


def cls_pg_forward(x, params, *, tb=1024):
    """x: [B, 1056] float32, params from prepare_params -> [B, 32] float32."""
    B, F = x.shape
    assert F == FEATURES, f"expected {FEATURES} input features, got {F}"

    t = _pick_tile(B, tb)
    grid = (pl.cdiv(B, t),)

    acts_dtype = params["compute_dtype"]
    x_itm = jnp.dtype(x.dtype).itemsize
    w_itm = jnp.dtype(acts_dtype).itemsize

    compiler_params = pltpu.CompilerParams(
        dimension_semantics=("parallel",),
        vmem_limit_bytes=40 * 1024 * 1024,   # safe on v7x (64 MiB physical)
    )

    if params["mode"] == "fused":
        cost = pl.CostEstimate(
            flops=2 * B * FEATURES * OUT,
            transcendentals=0,
            bytes_accessed=(B * FEATURES * x_itm      # x read
                            + FEATURES * OUT * w_itm  # folded weight
                            + OUT * 4                 # folded bias
                            + B * OUT * 4),           # output write
        )
        return pl.pallas_call(
            functools.partial(_cls_pg_fused_kernel, acts_dtype=acts_dtype),
            out_shape=jax.ShapeDtypeStruct((B, OUT), jnp.float32),
            grid=grid,
            in_specs=[
                pl.BlockSpec((t, FEATURES), lambda i: (i, 0)),     # x tile
                pl.BlockSpec((FEATURES, OUT), lambda i: (0, 0)),   # W (resident)
                pl.BlockSpec((1, OUT), lambda i: (0, 0)),          # b (resident)
            ],
            out_specs=pl.BlockSpec((t, OUT), lambda i: (i, 0)),
            compiler_params=compiler_params,
            cost_estimate=cost,
        )(x, params["w"], params["b"])

    cost = pl.CostEstimate(
        flops=2 * B * FEATURES * HIDDEN + 2 * B * HIDDEN * OUT,
        transcendentals=0,
        bytes_accessed=(B * FEATURES * x_itm            # x read
                        + FEATURES * HIDDEN * w_itm     # w1
                        + HIDDEN * OUT * w_itm          # w2
                        + HIDDEN * 4 + OUT * 4          # biases (f32)
                        + B * OUT * 4),                 # output write
    )
    return pl.pallas_call(
        functools.partial(_cls_pg_kernel, acts_dtype=acts_dtype),
        out_shape=jax.ShapeDtypeStruct((B, OUT), jnp.float32),
        grid=grid,
        in_specs=[
            pl.BlockSpec((t, FEATURES), lambda i: (i, 0)),        # x tile
            pl.BlockSpec((FEATURES, HIDDEN), lambda i: (0, 0)),   # w1 (resident)
            pl.BlockSpec((1, HIDDEN), lambda i: (0, 0)),          # b1 (resident)
            pl.BlockSpec((HIDDEN, OUT), lambda i: (0, 0)),        # w2 (resident)
            pl.BlockSpec((1, OUT), lambda i: (0, 0)),             # b2 (resident)
        ],
        out_specs=pl.BlockSpec((t, OUT), lambda i: (i, 0)),
        compiler_params=compiler_params,
        cost_estimate=cost,
    )(x, params["w1"], params["b1"], params["w2"], params["b2"])


# ------------------------------ test harness ---------------------------------


def init_params(key):
    """Deterministic init mimicking PyTorch Linear default (uniform ±1/sqrt(fan_in))."""
    k1, k2, k3, k4 = jax.random.split(key, 4)
    bound1 = 1.0 / (FEATURES ** 0.5)
    bound2 = 1.0 / (HIDDEN ** 0.5)
    w1 = jax.random.uniform(k1, (FEATURES, HIDDEN), jnp.float32, -bound1, bound1)
    b1 = jax.random.uniform(k2, (1, HIDDEN), jnp.float32, -bound1, bound1)
    w2 = jax.random.uniform(k3, (HIDDEN, OUT), jnp.float32, -bound2, bound2)
    b2 = jax.random.uniform(k4, (1, OUT), jnp.float32, -bound2, bound2)
    return w1, b1, w2, b2


if __name__ == "__main__":
    key = jax.random.PRNGKey(0)
    kx1, kx2, kp = jax.random.split(key, 3)

    w1, b1, w2, b2 = init_params(kp)

    # One-time parameter preparation (hoisted out of the forward pass).
    params_f32 = prepare_params(w1, b1, w2, b2)
    params_bf16 = prepare_params(w1, b1, w2, b2, compute_dtype=jnp.bfloat16)
    params_fused = prepare_params(w1, b1, w2, b2, fold_layers=True)

    # --- Small batch, two grid steps, exact f32 semantics. ---
    B1 = 16
    x1 = jax.random.normal(kx1, (B1, FEATURES), jnp.float32)
    ref1 = (x1 @ w1 + b1) @ w2 + b2
    out1 = jax.block_until_ready(cls_pg_forward(x1, params_f32))
    assert out1.shape == (B1, OUT)
    assert jnp.allclose(out1, ref1, atol=1e-4, rtol=1e-4), "f32 mismatch"

    # --- Ragged batch (partial last block, no wrapper padding). ---
    B2 = 100
    x2 = jax.random.normal(kx2, (B2, FEATURES), jnp.float32)
    ref2 = (x2 @ w1 + b1) @ w2 + b2
    out2 = jax.block_until_ready(cls_pg_forward(x2, params_f32))
    assert out2.shape == (B2, OUT)
    assert jnp.allclose(out2, ref2, atol=1e-4, rtol=1e-4), "ragged f32 mismatch"

    # --- bf16 MXU-operand path (in-kernel activation cast, f32 accumulation). ---
    out_bf16 = jax.block_until_ready(cls_pg_forward(x2, params_bf16))
    assert out_bf16.shape == (B2, OUT)
    assert jnp.allclose(out_bf16, ref2, atol=5e-2, rtol=5e-2), "bf16 mismatch"

    # --- Folded single-matmul path (f32); rounding order differs slightly. ---
    out_fused = jax.block_until_ready(cls_pg_forward(x2, params_fused))
    assert out_fused.shape == (B2, OUT)
    assert jnp.allclose(out_fused, ref2, atol=1e-3, rtol=1e-3), "fused mismatch"

    print("KERNEL_OK")
</pallas_src>

<mosaic_0001>
module attributes {stable_mosaic.version = 11 : i64} {
  func.func @_cls_pg_kernel(%arg0: i32, %arg1: memref<8x1056xf32, #tpu.memory_space<vmem>>, %arg2: memref<1056x256xf32, #tpu.memory_space<vmem>>, %arg3: memref<1x256xf32, #tpu.memory_space<vmem>>, %arg4: memref<256x32xf32, #tpu.memory_space<vmem>>, %arg5: memref<1x32xf32, #tpu.memory_space<vmem>>, %arg6: memref<8x32xf32, #tpu.memory_space<vmem>>) attributes {dimension_semantics = [#tpu.dimension_semantics<parallel>], iteration_bounds = array<i64: 2>, scalar_prefetch = 0 : i64, scratch_operands = 0 : i64, tpu.core_type = #tpu.core_type<tc>, window_params = [{transform_indices = @transform_0, window_bounds = array<i64: 8, 1056>}, {pipeline_mode = #tpu.pipeline_mode<synchronous>, transform_indices = @transform_1, window_bounds = array<i64: 1056, 256>}, {pipeline_mode = #tpu.pipeline_mode<synchronous>, transform_indices = @transform_2, window_bounds = array<i64: 1, 256>}, {pipeline_mode = #tpu.pipeline_mode<synchronous>, transform_indices = @transform_3, window_bounds = array<i64: 256, 32>}, {pipeline_mode = #tpu.pipeline_mode<synchronous>, transform_indices = @transform_4, window_bounds = array<i64: 1, 32>}, {transform_indices = @transform_5, window_bounds = array<i64: 8, 32>}]} {
    %c0 = arith.constant 0 : index
    %c0_0 = arith.constant 0 : index
    %0 = vector.load %arg1[%c0, %c0_0] : memref<8x1056xf32, #tpu.memory_space<vmem>>, vector<8x1056xf32>
    %c0_1 = arith.constant 0 : index
    %c0_2 = arith.constant 0 : index
    %1 = vector.load %arg2[%c0_1, %c0_2] : memref<1056x256xf32, #tpu.memory_space<vmem>>, vector<1056x256xf32>
    %cst = arith.constant dense<0.000000e+00> : vector<8x256xf32>
    %2 = tpu.matmul %0, %1, %cst {dimension_numbers = #tpu.dot_dimension_numbers<[1], [0], [0], [1], [0, 0, 1, 1], [], []>} : vector<8x1056xf32>, vector<1056x256xf32>, vector<8x256xf32> -> vector<8x256xf32>
    %c0_3 = arith.constant 0 : index
    %c0_4 = arith.constant 0 : index
    %3 = vector.load %arg3[%c0_3, %c0_4] : memref<1x256xf32, #tpu.memory_space<vmem>>, vector<1x256xf32>
    %4 = vector.broadcast %3 : vector<1x256xf32> to vector<8x256xf32>
    %5 = arith.addf %2, %4 : vector<8x256xf32>
    %c0_5 = arith.constant 0 : index
    %c0_6 = arith.constant 0 : index
    %6 = vector.load %arg4[%c0_5, %c0_6] : memref<256x32xf32, #tpu.memory_space<vmem>>, vector<256x32xf32>
    %cst_7 = arith.constant dense<0.000000e+00> : vector<8x32xf32>
    %7 = tpu.matmul %5, %6, %cst_7 {dimension_numbers = #tpu.dot_dimension_numbers<[1], [0], [0], [1], [0, 0, 1, 1], [], []>} : vector<8x256xf32>, vector<256x32xf32>, vector<8x32xf32> -> vector<8x32xf32>
    %c0_8 = arith.constant 0 : index
    %c0_9 = arith.constant 0 : index
    %8 = vector.load %arg5[%c0_8, %c0_9] : memref<1x32xf32, #tpu.memory_space<vmem>>, vector<1x32xf32>
    %9 = vector.broadcast %8 : vector<1x32xf32> to vector<8x32xf32>
    %10 = arith.addf %7, %9 : vector<8x32xf32>
    %c0_10 = arith.constant 0 : index
    %c0_11 = arith.constant 0 : index
    %11 = vector.load %arg6[%c0_10, %c0_11] : memref<8x32xf32, #tpu.memory_space<vmem>>, vector<8x32xf32>
    tpu.vector_store %arg6[%c0_10, %c0_11], %10 {strides = array<i32>} : memref<8x32xf32, #tpu.memory_space<vmem>>, vector<8x32xf32>,
    return
  }
  func.func @transform_0(%arg0: i32) -> (i32, i32) {
    %c0_i32 = arith.constant 0 : i32
    %c0_i32_0 = arith.constant 0 : i32
    return %arg0, %c0_i32 : i32, i32
  }
  func.func @transform_1(%arg0: i32) -> (i32, i32) {
    %c0_i32 = arith.constant 0 : i32
    %c0_i32_0 = arith.constant 0 : i32
    %c0_i32_1 = arith.constant 0 : i32
    return %c0_i32, %c0_i32_0 : i32, i32
  }
  func.func @transform_2(%arg0: i32) -> (i32, i32) {
    %c0_i32 = arith.constant 0 : i32
    %c0_i32_0 = arith.constant 0 : i32
    %c0_i32_1 = arith.constant 0 : i32
    return %c0_i32, %c0_i32_0 : i32, i32
  }
  func.func @transform_3(%arg0: i32) -> (i32, i32) {
    %c0_i32 = arith.constant 0 : i32
    %c0_i32_0 = arith.constant 0 : i32
    %c0_i32_1 = arith.constant 0 : i32
    return %c0_i32, %c0_i32_0 : i32, i32
  }
  func.func @transform_4(%arg0: i32) -> (i32, i32) {
    %c0_i32 = arith.constant 0 : i32
    %c0_i32_0 = arith.constant 0 : i32
    %c0_i32_1 = arith.constant 0 : i32
    return %c0_i32, %c0_i32_0 : i32, i32
  }
  func.func @transform_5(%arg0: i32) -> (i32, i32) {
    %c0_i32 = arith.constant 0 : i32
    %c0_i32_0 = arith.constant 0 : i32
    return %arg0, %c0_i32 : i32, i32
  }
}

</mosaic_0001>

<bundles_post_ra>
// kernel: tpu_custom_call.1
= control target key start
LH: loop header
LB: loop body
LE: loop exit
PB: predicated region body
PF: predicated region fallthrough
CT: control target
= control target key end

     0   :  { %s1759_s0 = inlined_call_operand.hbm [shape: f32[16,1056], index: 0, kind: input, shape index: {}]   ;;  %s1760_s1 = inlined_call_operand.hbm [shape: f32[1056,256], index: 1, kind: input, shape index: {}]   ;;  %s1761_s2 = inlined_call_operand.hbm [shape: f32[1,256], index: 2, kind: input, shape index: {}]   ;;  %s1762_s3 = inlined_call_operand.vmem [shape: f32[256,32], index: 3, kind: input, shape index: {}]   ;;  %s1763_s4 = inlined_call_operand.hbm [shape: f32[1,32], index: 4, kind: input, shape index: {}]   ;;  %s1764_s5 = inlined_call_operand.hbm [shape: f32[16,32], index: 5, kind: output, shape index: {}]  }
   0x1   :  { %1765 = sst [smem:[#allocation15_spill]] %s1760_s1 }
   0x2   :  { %1766 = sst [smem:[#allocation16_spill]] %s1761_s2 }
   0x3   :  { %10 = vsyncpa [#allocation3], 0 }
   0x4   :  { %12 = vsyncpa [#allocation3 + $0x1], 0 }
   0x5   :  { %13 = vsyncpa [#allocation6], 0 }
   0x6   :  { %14 = vsyncpa [#allocation9], 0 }
   0x7   :  { %15 = vsyncpa [#allocation4], 0 }
   0x8   :  { %17 = vsyncpa [#allocation4 + $0x1], 0  ;;  %s1456_s18 = smov 0   ;;  %s1458_s19 = smov 0  }
   0x9   :  { %s1460_s20 = smov 0   ;;  %s1462_s21 = smov 0  }
   0xa LB: > { %s1767_s1 = sld [smem:[#allocation15_spill]]  ;;  %s1480_s25 = sadd.s32 4294967295, %s1419_s21   ;;  %s1419_s21 = sphi %s1462_s21, %s1779_s21   ;;  %s1415_s20 = sphi %s1460_s20, %s1778_s20   ;;  %s1411_s19 = sphi %s1458_s19, %s1777_s19   ;;  %s1407_s18 = sphi %s1456_s18, %s1776_s18  }
   0xb   : > { %p1125_p0 = scmp.ge.s32.totalorder %s1419_s21, 1  ;;  %p44_p1 = scmp.eq.s32.totalorder %s1480_s25, 0 }
   0xc   : > { %p164_p2 = scmp.lt.s32.totalorder %s1419_s21, 3  ;;  %s1421_s27 = smov [#allocation5]  }
   0xd   : > { %s177_s28 = sshll.u32 %s1421_s27, 4  ;;  %s1769_s2 = sld [smem:[#allocation16_spill]]  ;;  %s178_s28 = int_to_ptr.vmem [resolvable:$true] %s177_s28 }
   0xe   : > { %p1485_p3 = pnand %p1125_p0, %p164_p2  ;;  %s205_s10 = sshll.u32 %s1763_s4, 4  ;;  %s206_s10 = int_to_ptr.hbm [resolvable:$true] %s205_s10 }
   0xf   : > { %s1422_s11 = smov [#allocation7]   ;;  %s1423_s13 = smov 256  }
  0x10   : > { %s175_s24 = sshll.u32 %s1767_s1, 4  ;;  %p1161_p4 = pneg %p1485_p3  ;;  %s176_s24 = int_to_ptr.hbm [resolvable:$true] %s175_s24 }
  0x11   : > { %s192_s12 = sshll.u32 %s1422_s11, 4  ;;  %s1424_s14 = smov 16   ;;  %s193_s12 = int_to_ptr.vmem [resolvable:$true] %s192_s12 }
  0x12   : > { %p1497_p6 = pnand %p1161_p4, %p44_p1  ;;  %s1425_s15 = smov [#allocation8]  }
  0x13   : > { %s190_s6 = sshll.u32 %s1769_s2, 4  ;;  %s207_s16 = sshll.u32 %s1425_s15, 4  ;;  %s191_s6 = int_to_ptr.hbm [resolvable:$true] %s190_s6  ;;  %s208_s16 = int_to_ptr.vmem [resolvable:$true] %s207_s16 }
  0x14   : > { %1164 = dma.hbm_to_vmem [thread:$0]  (!%p1497_p6), %s176_s24, 33792, %s178_s28, [#allocation6], %s1423_s13, %s1423_s13, %s1424_s14  }
  0x15   : > { %1167 = dma.hbm_to_vmem [thread:$0]  (!%p1497_p6), %s191_s6, 32, %s193_s12, [#allocation6]  }
  0x16   : > { %1170 = dma.hbm_to_vmem [thread:$0]  (!%p1497_p6), %s206_s10, 16, %s208_s16, [#allocation9]  }
  0x17   : > { %s1124_s17 = sadd.s32 4294967294, %s1419_s21   ;;  %s1512_s22 = sadd.s32 1, %s1419_s21  }
  0x18   : > { %s30_s23 = sadd.s32 1, %s1415_s20  ;;  %s27_s24 = ssub.s32 %s1419_s21, %s1512_s22 }
  0x19   : > { %p37_p7 = scmp.ne.s32.totalorder %s1415_s20, %s1411_s19  ;;  %p28_p8 = scmp.eq.s32.totalorder %s27_s24, 0 }
  0x1a   : > { %p38_p9 = scmp.eq.s32.totalorder %s1419_s21, 0  ;;  %p43_p10 = scmp.ne.s32.totalorder %s1411_s19, %s1407_s18 }
  0x1b   : > { %p151_p11 = scmp.eq.s32.totalorder %s1480_s25, 1  ;;  %p157_p2 = scmp.eq.s32.totalorder %s1124_s17, 1 }
  0x1c   : > { %s1524_s27 = scalar_select %p28_p8, %s1415_s20, %s30_s23  }
  0x1d   : > { %p39_p12 = por %p38_p9, %p37_p7  ;;  %p1528_p13 = por %p44_p1, %p43_p10 }
  0x1e   : > { %p1532_p0 = por %p151_p11, %p37_p7  ;;  %p1182_p4 = scmp.lt.s32.totalorder %s1419_s21, 2 }
  0x1f   : > { %s218_s30 = sand.u32 1, %s1415_s20   ;;  %p1538_p6 = por %p157_p2, %p43_p10 }
  0x20   : > { %s1142_s7 = smul.u32 72, %s218_s30  ;;  %p1542_p8 = pnand %p1182_p4, %p39_p12 }
  0x21   : > { %s1143_s9 = smul.u32 72, %s1419_s21  ;;  %s219_s16 = scalar_lea.sflag [#allocation3], %s218_s30 }
  0x22   : > { %s222_s13 = scalar_lea.vmem [#allocation2], %s1142_s7  ;;  %p1319_p9 = pneg %p1542_p8 }
  0x23   : > { %s227_s12 = scalar_lea.hbm %s1759_s0, %s1143_s9  ;;  %s231_s14 = sshll.u32 %s222_s13, 4  ;;  %s232_s14 = int_to_ptr.vmem [resolvable:$true] %s231_s14 }
  0x24   : > { %s229_s15 = sshll.u32 %s227_s12, 4  ;;  %s1322_s2 = scalar_lea.hbm %s1759_s0, 144  ;;  %s230_s15 = int_to_ptr.hbm [resolvable:$true] %s229_s15 }
  0x25   : > { %s1315_s17 = sshra.s32 %s230_s15, 4  ;;  %s1316_s17 = int_to_ptr.hbm [resolvable:$true] %s1315_s17 }
  0x26   : > { %s1317_s23 = scalar_lea.hbm %s1316_s17, 72  ;;  %p1323_p12 = scmp.lt.s32.totalorder %s1316_s17, %s1759_s0 }
  0x27   : > { %p1318_p7 = scmp.ne.s32.totalorder %s1316_s17, %s1317_s23  ;;  %p1324_p2 = scmp.lt.s32.totalorder %s1322_s2, %s1317_s23 }
  0x29   : > { %p1320_p10 = pnand %p1319_p9, %p1318_p7  ;;  %p1325_p4 = por %p1324_p2, %p1323_p12 }
  0x2b   : > { %p1321_p11 = pneg %p1320_p10 }
  0x2d   : > { %p1326_p5 = pnand %p1325_p4, %p1321_p11 }
  0x2f   : > { %1329 = shalt.err (!%p1326_p5)
}
  0x30   : > { %1174 = dma.hbm_to_vmem [thread:$0]  (!%p1542_p8), %s230_s15, 1152, %s232_s14, %s219_s16  }
  0x31   : > { %240 = sbr.rel (%p1485_p3) target bundleno = 470 (0x1d6), region = 40  ;;  %s1563_s30 = sand.u32 (!%p1485_p3), 1, %s1411_s19  }
  0x32   : > { %s1144_s1 = smul.u32 (!%p1485_p3), 72, %s1563_s30  ;;  %s243_s7 = scalar_lea.sflag (!%p1485_p3), [#allocation3], %s1563_s30 }
  0x34   : > { %s1567_s11 = scalar_lea.vmem (!%p1485_p3), [#allocation2], %s1144_s1 }
  0x36   : > { %1390 = dma.done.wait (%p1528_p13), %s243_s7, 1152  }
  0x37   : > { %1392 = vsyncadd (%p1528_p13), %s243_s7, 4294966144 }
  0x38   : > { %1394 = dma.done.wait (%p44_p1), [#allocation6], 33824  }
  0x39   : > { %1396 = vsyncadd (%p44_p1), [#allocation6], 4294933472 }
  0x3a   : > { %1398 = dma.done.wait (%p44_p1), [#allocation9], 16  }
  0x3b   : > { %1400 = vsyncadd (%p44_p1), [#allocation9], 4294967280  ;;  %v392_v0 = vld [vmem:[#allocation5 + $0x2f0] sm:$0xff]  ;;  %v390_v1 = vld [vmem:[#allocation5 + $0x2e0] sm:$0xff]  ;;  %vm568_vm0 = vcmask 261120   ;;  %s1135_s9 = sshll.u32 %s1563_s30, 3 }
  0x3c   : > { %v424_v2 = vld [vmem:[#allocation5 + $0x3f0] sm:$0xff]  ;;  %612 = vmatpush.msra.mxu2 %v392_v0  ;;  %v422_v6 = vld [vmem:[#allocation5 + $0x3e0] sm:$0xff]  ;;  %s1139_s1 = sshll.u32 %s1480_s25, 3  ;;  %s288_s26 = scalar_lea.vmem [#allocation10], %s1135_s9 }
  0x3d   : > { %632 = vmatpush.msra.mxu3 %v424_v2  ;;  %v328_v3 = vld [vmem:[#allocation5 + $0xf0] sm:$0xff]  ;;  %v326_v7 = vld [vmem:[#allocation5 + $0xe0] sm:$0xff]  ;;  %s1020_s2 = scalar_lea.hbm %s1764_s5, %s1139_s1  ;;  %s1022_s28 = sshll.u32 %s288_s26, 4  ;;  %s1023_s28 = int_to_ptr.vmem [resolvable:$true] %s1022_s28 }
  0x3e   : > { %v360_v4 = vld [vmem:[#allocation5 + $0x1f0] sm:$0xff]  ;;  %572 = vmatpush.msra.mxu0 %v328_v3  ;;  %v358_v8 = vld [vmem:[#allocation5 + $0x1e0] sm:$0xff]  ;;  %613 = vmatpush.msra.mxu2 %v390_v1  ;;  %s1024_s8 = sshll.u32 %s1020_s2, 4  ;;  %s1010_s12 = scalar_lea.sflag [#allocation4], %s1563_s30  ;;  %s1025_s8 = int_to_ptr.hbm [resolvable:$true] %s1024_s8 }
  0x3f   : > { %v388_v5 = vld [vmem:[#allocation5 + $0x2d0] sm:$0xff]  ;;  %592 = vmatpush.msra.mxu1 %v360_v4  ;;  %633 = vmatpush.msra.mxu3 %v422_v6  ;;  %v386_v11 = vld [vmem:[#allocation5 + $0x2c0] sm:$0xff]  ;;  %s1359_s13 = sshra.s32 %s1025_s8, 4  ;;  %s1365_s16 = scalar_lea.hbm %s1764_s5, 16  ;;  %s1360_s13 = int_to_ptr.hbm [resolvable:$true] %s1359_s13 }
  0x40   : > { %v420_v9 = vld [vmem:[#allocation5 + $0x3d0] sm:$0xff]  ;;  %573 = vmatpush.msra.mxu0 %v326_v7  ;;  %v418_v13 = vld [vmem:[#allocation5 + $0x3c0] sm:$0xff]  ;;  %614 = vmatpush.msra.mxu2 %v388_v5  ;;  %s1361_s25 = scalar_lea.hbm %s1360_s13, 8  ;;  %p1366_p13 = scmp.lt.s32.totalorder %s1360_s13, %s1764_s5 }
  0x41   : > { %v324_v10 = vld [vmem:[#allocation5 + $0xd0] sm:$0xff]  ;;  %593 = vmatpush.msra.mxu1 %v358_v8  ;;  %634 = vmatpush.msra.mxu3 %v420_v9  ;;  %v322_v14 = vld [vmem:[#allocation5 + $0xc0] sm:$0xff]  ;;  %p1362_p1 = scmp.ne.s32.totalorder %s1360_s13, %s1361_s25  ;;  %p1367_p8 = scmp.lt.s32.totalorder %s1365_s16, %s1361_s25 }
  0x42   : > { %v356_v12 = vld [vmem:[#allocation5 + $0x1d0] sm:$0xff]  ;;  %v354_v15 = vld [vmem:[#allocation5 + $0x1c0] sm:$0xff]  ;;  %574 = vmatpush.msra.mxu0 %v324_v10  ;;  %615 = vmatpush.msra.mxu2 %v386_v11 }
  0x43   : > { %594 = vmatpush.msra.mxu1 %v356_v12  ;;  %v384_v16 = vld [vmem:[#allocation5 + $0x2b0] sm:$0xff]  ;;  %635 = vmatpush.msra.mxu3 %v418_v13  ;;  %v382_v20 = vld [vmem:[#allocation5 + $0x2a0] sm:$0xff]  ;;  %p1363_p3 = pnand %p1362_p1, %p1532_p0  ;;  %p1368_p7 = por %p1367_p8, %p1366_p13 }
  0x44   : > { %v416_v17 = vld [vmem:[#allocation5 + $0x3b0] sm:$0xff]  ;;  %575 = vmatpush.msra.mxu0 %v322_v14  ;;  %v414_v21 = vld [vmem:[#allocation5 + $0x3a0] sm:$0xff]  ;;  %616 = vmatpush.msra.mxu2 %v384_v16 }
  0x45   : > { %v320_v18 = vld [vmem:[#allocation5 + $0xb0] sm:$0xff]  ;;  %595 = vmatpush.msra.mxu1 %v354_v15  ;;  %636 = vmatpush.msra.mxu3 %v416_v17  ;;  %v318_v22 = vld [vmem:[#allocation5 + $0xa0] sm:$0xff]  ;;  %p1364_p5 = pneg %p1363_p3 }
  0x46   : > { %v352_v19 = vld [vmem:[#allocation5 + $0x1b0] sm:$0xff]  ;;  %v350_v23 = vld [vmem:[#allocation5 + $0x1a0] sm:$0xff]  ;;  %576 = vmatpush.msra.mxu0 %v320_v18  ;;  %617 = vmatpush.msra.mxu2 %v382_v20 }
  0x47   : > { %596 = vmatpush.msra.mxu1 %v352_v19  ;;  %v380_v24 = vld [vmem:[#allocation5 + $0x290] sm:$0xff]  ;;  %637 = vmatpush.msra.mxu3 %v414_v21  ;;  %v378_v28 = vld [vmem:[#allocation5 + $0x280] sm:$0xff]  ;;  %p1369_p9 = pnand %p1368_p7, %p1364_p5 }
  0x48   : > { %v412_v25 = vld [vmem:[#allocation5 + $0x390] sm:$0xff]  ;;  %577 = vmatpush.msra.mxu0 %v318_v22  ;;  %v410_v29 = vld [vmem:[#allocation5 + $0x380] sm:$0xff]  ;;  %618 = vmatpush.msra.mxu2 %v380_v24 }
  0x49   : > { %v316_v26 = vld [vmem:[#allocation5 + $0x90] sm:$0xff]  ;;  %597 = vmatpush.msra.mxu1 %v350_v23  ;;  %638 = vmatpush.msra.mxu3 %v412_v25  ;;  %v314_v30 = vld [vmem:[#allocation5 + $0x80] sm:$0xff] }
  0x4a   : > { %v348_v27 = vld [vmem:[#allocation5 + $0x190] sm:$0xff]  ;;  %v346_v31 = vld [vmem:[#allocation5 + $0x180] sm:$0xff]  ;;  %578 = vmatpush.msra.mxu0 %v316_v26  ;;  %619 = vmatpush.msra.mxu2 %v378_v28 }
  0x4b   : > { %598 = vmatpush.msra.mxu1 %v348_v27  ;;  %v376_v32 = vld [vmem:[#allocation5 + $0x270] sm:$0xff]  ;;  %639 = vmatpush.msra.mxu3 %v410_v29  ;;  %v374_v36 = vld [vmem:[#allocation5 + $0x260] sm:$0xff] }
  0x4c   : > { %v408_v33 = vld [vmem:[#allocation5 + $0x370] sm:$0xff]  ;;  %579 = vmatpush.msra.mxu0 %v314_v30  ;;  %v406_v37 = vld [vmem:[#allocation5 + $0x360] sm:$0xff]  ;;  %620 = vmatpush.msra.mxu2 %v376_v32 }
  0x4d   : > { %v312_v34 = vld [vmem:[#allocation5 + $0x70] sm:$0xff]  ;;  %599 = vmatpush.msra.mxu1 %v346_v31  ;;  %640 = vmatpush.msra.mxu3 %v408_v33  ;;  %v310_v38 = vld [vmem:[#allocation5 + $0x60] sm:$0xff] }
  0x4e   : > { %v344_v35 = vld [vmem:[#allocation5 + $0x170] sm:$0xff]  ;;  %v342_v39 = vld [vmem:[#allocation5 + $0x160] sm:$0xff]  ;;  %580 = vmatpush.msra.mxu0 %v312_v34  ;;  %621 = vmatpush.msra.mxu2 %v374_v36 }
  0x4f   : > { %600 = vmatpush.msra.mxu1 %v344_v35  ;;  %v372_v40 = vld [vmem:[#allocation5 + $0x250] sm:$0xff]  ;;  %641 = vmatpush.msra.mxu3 %v406_v37  ;;  %v370_v44 = vld [vmem:[#allocation5 + $0x240] sm:$0xff] }
  0x50   : > { %v404_v41 = vld [vmem:[#allocation5 + $0x350] sm:$0xff]  ;;  %581 = vmatpush.msra.mxu0 %v310_v38  ;;  %v402_v45 = vld [vmem:[#allocation5 + $0x340] sm:$0xff]  ;;  %622 = vmatpush.msra.mxu2 %v372_v40 }
  0x51   : > { %v308_v42 = vld [vmem:[#allocation5 + $0x50] sm:$0xff]  ;;  %601 = vmatpush.msra.mxu1 %v342_v39  ;;  %642 = vmatpush.msra.mxu3 %v404_v41  ;;  %v306_v46 = vld [vmem:[#allocation5 + $0x40] sm:$0xff] }
  0x52   : > { %v340_v43 = vld [vmem:[#allocation5 + $0x150] sm:$0xff]  ;;  %v338_v47 = vld [vmem:[#allocation5 + $0x140] sm:$0xff]  ;;  %582 = vmatpush.msra.mxu0 %v308_v42  ;;  %623 = vmatpush.msra.mxu2 %v370_v44 }
  0x53   : > { %602 = vmatpush.msra.mxu1 %v340_v43  ;;  %v368_v48 = vld [vmem:[#allocation5 + $0x230] sm:$0xff]  ;;  %643 = vmatpush.msra.mxu3 %v402_v45  ;;  %v366_v52 = vld [vmem:[#allocation5 + $0x220] sm:$0xff] }
  0x54   : > { %v400_v49 = vld [vmem:[#allocation5 + $0x330] sm:$0xff]  ;;  %583 = vmatpush.msra.mxu0 %v306_v46  ;;  %v398_v53 = vld [vmem:[#allocation5 + $0x320] sm:$0xff]  ;;  %624 = vmatpush.msra.mxu2 %v368_v48 }
  0x55   : > { %v304_v50 = vld [vmem:[#allocation5 + $0x30] sm:$0xff]  ;;  %603 = vmatpush.msra.mxu1 %v338_v47  ;;  %644 = vmatpush.msra.mxu3 %v400_v49  ;;  %v302_v54 = vld [vmem:[#allocation5 + $0x20] sm:$0xff] }
  0x56   : > { %v336_v51 = vld [vmem:[#allocation5 + $0x130] sm:$0xff]  ;;  %v334_v55 = vld [vmem:[#allocation5 + $0x120] sm:$0xff]  ;;  %584 = vmatpush.msra.mxu0 %v304_v50  ;;  %625 = vmatpush.msra.mxu2 %v366_v52 }
  0x57   : > { %604 = vmatpush.msra.mxu1 %v336_v51  ;;  %v364_v56 = vld [vmem:[#allocation5 + $0x210] sm:$0xff]  ;;  %645 = vmatpush.msra.mxu3 %v398_v53  ;;  %v362_v60 = vld [vmem:[#allocation5 + $0x200] sm:$0xff] }
  0x58   : > { %v396_v57 = vld [vmem:[#allocation5 + $0x310] sm:$0xff]  ;;  %585 = vmatpush.msra.mxu0 %v302_v54  ;;  %v394_v61 = vld [vmem:[#allocation5 + $0x300] sm:$0xff]  ;;  %626 = vmatpush.msra.mxu2 %v364_v56 }
  0x59   : > { %v300_v58 = vld [vmem:[#allocation5 + $0x10] sm:$0xff]  ;;  %605 = vmatpush.msra.mxu1 %v334_v55  ;;  %646 = vmatpush.msra.mxu3 %v396_v57  ;;  %v298_v63 = vld [vmem:[#allocation5] sm:$0xff] }
  0x5a   : > { %v332_v59 = vld [vmem:[#allocation5 + $0x110] sm:$0xff]  ;;  %586 = vmatpush.msra.mxu0 %v300_v58  ;;  %v330_v1 = vld [vmem:[#allocation5 + $0x100] sm:$0xff]  ;;  %627 = vmatpush.msra.mxu2 %v362_v60 }
  0x5b   : > { %v520_v62 = vld [vmem:[#allocation5 + $0x6f0] sm:$0xff]  ;;  %606 = vmatpush.msra.mxu1 %v332_v59  ;;  %647 = vmatpush.msra.mxu3 %v394_v61  ;;  %v518_v2 = vld [vmem:[#allocation5 + $0x6e0] sm:$0xff] }
  0x5c   : > { %v552_v0 = vld [vmem:[#allocation5 + $0x7f0] sm:$0xff]  ;;  %692 = vmatpush.msrb.mxu2 %v520_v62  ;;  %587 = vmatpush.msra.mxu0 %v298_v63  ;;  %v550_v5 = vld [vmem:[#allocation5 + $0x7e0] sm:$0xff]  ;;  %v361_v62 = vld [vmem:[#allocation5 + $0x1f8] sm:$0xff] }
  0x5d   : > { %v456_v3 = vld [vmem:[#allocation5 + $0x4f0] sm:$0xff]  ;;  %712 = vmatpush.msrb.mxu3 %v552_v0  ;;  %607 = vmatpush.msra.mxu1 %v330_v1  ;;  %v454_v7 = vld [vmem:[#allocation5 + $0x4e0] sm:$0xff] }
  0x5e   : > { %v488_v4 = vld [vmem:[#allocation5 + $0x5f0] sm:$0xff]  ;;  %693 = vmatpush.msrb.mxu2 %v518_v2  ;;  %652 = vmatpush.msrb.mxu0 %v456_v3  ;;  %v486_v8 = vld [vmem:[#allocation5 + $0x5e0] sm:$0xff]  ;;  %v359_v3 = vld [vmem:[#allocation5 + $0x1e8] sm:$0xff] }
  0x5f   : > { %v516_v6 = vld [vmem:[#allocation5 + $0x6d0] sm:$0xff]  ;;  %672 = vmatpush.msrb.mxu1 %v488_v4  ;;  %713 = vmatpush.msrb.mxu3 %v550_v5  ;;  %v514_v10 = vld [vmem:[#allocation5 + $0x6c0] sm:$0xff]  ;;  %v393_v4 = vld [vmem:[#allocation5 + $0x2f8] sm:$0xff] }
  0x60   : > { %v548_v9 = vld [vmem:[#allocation5 + $0x7d0] sm:$0xff]  ;;  %694 = vmatpush.msrb.mxu2 %v516_v6  ;;  %653 = vmatpush.msrb.mxu0 %v454_v7  ;;  %v546_v13 = vld [vmem:[#allocation5 + $0x7c0] sm:$0xff] }
  0x61   : > { %v452_v11 = vld [vmem:[#allocation5 + $0x4d0] sm:$0xff]  ;;  %673 = vmatpush.msrb.mxu1 %v486_v8  ;;  %714 = vmatpush.msrb.mxu3 %v548_v9  ;;  %v450_v15 = vld [vmem:[#allocation5 + $0x4c0] sm:$0xff]  ;;  %v329_v8 = vld [vmem:[#allocation5 + $0xf8] sm:$0xff] }
  0x62   : > { %v484_v12 = vld [vmem:[#allocation5 + $0x5d0] sm:$0xff]  ;;  %695 = vmatpush.msrb.mxu2 %v514_v10  ;;  %654 = vmatpush.msrb.mxu0 %v452_v11  ;;  %v482_v16 = vld [vmem:[#allocation5 + $0x5c0] sm:$0xff]  ;;  %v357_v9 = vld [vmem:[#allocation5 + $0x1d8] sm:$0xff] }
  0x63   : > { %v512_v14 = vld [vmem:[#allocation5 + $0x6b0] sm:$0xff]  ;;  %674 = vmatpush.msrb.mxu1 %v484_v12  ;;  %715 = vmatpush.msrb.mxu3 %v546_v13  ;;  %v510_v18 = vld [vmem:[#allocation5 + $0x6a0] sm:$0xff]  ;;  %v391_v10 = vld [vmem:[#allocation5 + $0x2e8] sm:$0xff] }
  0x64   : > { %v544_v17 = vld [vmem:[#allocation5 + $0x7b0] sm:$0xff]  ;;  %696 = vmatpush.msrb.mxu2 %v512_v14  ;;  %655 = vmatpush.msrb.mxu0 %v450_v15  ;;  %v542_v21 = vld [vmem:[#allocation5 + $0x7a0] sm:$0xff]  ;;  %v327_v12 = vld [vmem:[#allocation5 + $0xe8] sm:$0xff] }
  0x65   : > { %v448_v19 = vld [vmem:[#allocation5 + $0x4b0] sm:$0xff]  ;;  %675 = vmatpush.msrb.mxu1 %v482_v16  ;;  %716 = vmatpush.msrb.mxu3 %v544_v17  ;;  %v446_v23 = vld [vmem:[#allocation5 + $0x4a0] sm:$0xff]  ;;  %v355_v13 = vld [vmem:[#allocation5 + $0x1c8] sm:$0xff] }
  0x66   : > { %v480_v20 = vld [vmem:[#allocation5 + $0x5b0] sm:$0xff]  ;;  %697 = vmatpush.msrb.mxu2 %v510_v18  ;;  %656 = vmatpush.msrb.mxu0 %v448_v19  ;;  %v478_v24 = vld [vmem:[#allocation5 + $0x5a0] sm:$0xff]  ;;  %v389_v14 = vld [vmem:[#allocation5 + $0x2d8] sm:$0xff] }
  0x67   : > { %v508_v22 = vld [vmem:[#allocation5 + $0x690] sm:$0xff]  ;;  %676 = vmatpush.msrb.mxu1 %v480_v20  ;;  %717 = vmatpush.msrb.mxu3 %v542_v21  ;;  %v506_v26 = vld [vmem:[#allocation5 + $0x680] sm:$0xff]  ;;  %v325_v17 = vld [vmem:[#allocation5 + $0xd8] sm:$0xff] }
  0x68   : > { %v540_v25 = vld [vmem:[#allocation5 + $0x790] sm:$0xff]  ;;  %698 = vmatpush.msrb.mxu2 %v508_v22  ;;  %657 = vmatpush.msrb.mxu0 %v446_v23  ;;  %v538_v29 = vld [vmem:[#allocation5 + $0x780] sm:$0xff]  ;;  %v353_v18 = vld [vmem:[#allocation5 + $0x1b8] sm:$0xff] }
  0x69   : > { %v444_v27 = vld [vmem:[#allocation5 + $0x490] sm:$0xff]  ;;  %677 = vmatpush.msrb.mxu1 %v478_v24  ;;  %718 = vmatpush.msrb.mxu3 %v540_v25  ;;  %v442_v31 = vld [vmem:[#allocation5 + $0x480] sm:$0xff]  ;;  %v387_v19 = vld [vmem:[#allocation5 + $0x2c8] sm:$0xff] }
  0x6a   : > { %v476_v28 = vld [vmem:[#allocation5 + $0x590] sm:$0xff]  ;;  %699 = vmatpush.msrb.mxu2 %v506_v26  ;;  %658 = vmatpush.msrb.mxu0 %v444_v27  ;;  %v474_v32 = vld [vmem:[#allocation5 + $0x580] sm:$0xff]  ;;  %v323_v23 = vld [vmem:[#allocation5 + $0xc8] sm:$0xff] }
  0x6b   : > { %v504_v30 = vld [vmem:[#allocation5 + $0x670] sm:$0xff]  ;;  %678 = vmatpush.msrb.mxu1 %v476_v28  ;;  %719 = vmatpush.msrb.mxu3 %v538_v29  ;;  %v502_v34 = vld [vmem:[#allocation5 + $0x660] sm:$0xff]  ;;  %v351_v24 = vld [vmem:[#allocation5 + $0x1a8] sm:$0xff] }
  0x6c   : > { %v536_v33 = vld [vmem:[#allocation5 + $0x770] sm:$0xff]  ;;  %700 = vmatpush.msrb.mxu2 %v504_v30  ;;  %659 = vmatpush.msrb.mxu0 %v442_v31  ;;  %v534_v37 = vld [vmem:[#allocation5 + $0x760] sm:$0xff]  ;;  %v385_v25 = vld [vmem:[#allocation5 + $0x2b8] sm:$0xff] }
  0x6d   : > { %v440_v35 = vld [vmem:[#allocation5 + $0x470] sm:$0xff]  ;;  %679 = vmatpush.msrb.mxu1 %v474_v32  ;;  %720 = vmatpush.msrb.mxu3 %v536_v33  ;;  %v438_v39 = vld [vmem:[#allocation5 + $0x460] sm:$0xff]  ;;  %v425_v26 = vld [vmem:[#allocation5 + $0x3f8] sm:$0xff] }
  0x6e   : > { %v472_v36 = vld [vmem:[#allocation5 + $0x570] sm:$0xff]  ;;  %701 = vmatpush.msrb.mxu2 %v502_v34  ;;  %660 = vmatpush.msrb.mxu0 %v440_v35  ;;  %v470_v40 = vld [vmem:[#allocation5 + $0x560] sm:$0xff]  ;;  %v321_v28 = vld [vmem:[#allocation5 + $0xb8] sm:$0xff] }
  0x6f   : > { %v500_v38 = vld [vmem:[#allocation5 + $0x650] sm:$0xff]  ;;  %680 = vmatpush.msrb.mxu1 %v472_v36  ;;  %721 = vmatpush.msrb.mxu3 %v534_v37  ;;  %v498_v42 = vld [vmem:[#allocation5 + $0x640] sm:$0xff]  ;;  %v349_v29 = vld [vmem:[#allocation5 + $0x198] sm:$0xff] }
  0x70   : > { %v532_v41 = vld [vmem:[#allocation5 + $0x750] sm:$0xff]  ;;  %702 = vmatpush.msrb.mxu2 %v500_v38  ;;  %661 = vmatpush.msrb.mxu0 %v438_v39  ;;  %v530_v45 = vld [vmem:[#allocation5 + $0x740] sm:$0xff]  ;;  %v383_v30 = vld [vmem:[#allocation5 + $0x2a8] sm:$0xff] }
  0x71   : > { %v436_v43 = vld [vmem:[#allocation5 + $0x450] sm:$0xff]  ;;  %681 = vmatpush.msrb.mxu1 %v470_v40  ;;  %722 = vmatpush.msrb.mxu3 %v532_v41  ;;  %v434_v47 = vld [vmem:[#allocation5 + $0x440] sm:$0xff]  ;;  %v423_v31 = vld [vmem:[#allocation5 + $0x3e8] sm:$0xff] }
  0x72   : > { %v468_v44 = vld [vmem:[#allocation5 + $0x550] sm:$0xff]  ;;  %703 = vmatpush.msrb.mxu2 %v498_v42  ;;  %662 = vmatpush.msrb.mxu0 %v436_v43  ;;  %v466_v48 = vld [vmem:[#allocation5 + $0x540] sm:$0xff]  ;;  %v319_v32 = vld [vmem:[#allocation5 + $0xa8] sm:$0xff] }
  0x73   : > { %v496_v46 = vld [vmem:[#allocation5 + $0x630] sm:$0xff]  ;;  %682 = vmatpush.msrb.mxu1 %v468_v44  ;;  %723 = vmatpush.msrb.mxu3 %v530_v45  ;;  %v494_v50 = vld [vmem:[#allocation5 + $0x620] sm:$0xff]  ;;  %v347_v33 = vld [vmem:[#allocation5 + $0x188] sm:$0xff] }
  0x74   : > { %v528_v49 = vld [vmem:[#allocation5 + $0x730] sm:$0xff]  ;;  %704 = vmatpush.msrb.mxu2 %v496_v46  ;;  %663 = vmatpush.msrb.mxu0 %v434_v47  ;;  %v526_v53 = vld [vmem:[#allocation5 + $0x720] sm:$0xff]  ;;  %v381_v34 = vld [vmem:[#allocation5 + $0x298] sm:$0xff] }
  0x75   : > { %v432_v51 = vld [vmem:[#allocation5 + $0x430] sm:$0xff]  ;;  %683 = vmatpush.msrb.mxu1 %v466_v48  ;;  %724 = vmatpush.msrb.mxu3 %v528_v49  ;;  %v430_v55 = vld [vmem:[#allocation5 + $0x420] sm:$0xff]  ;;  %v421_v35 = vld [vmem:[#allocation5 + $0x3d8] sm:$0xff] }
  0x76   : > { %v464_v52 = vld [vmem:[#allocation5 + $0x530] sm:$0xff]  ;;  %705 = vmatpush.msrb.mxu2 %v494_v50  ;;  %664 = vmatpush.msrb.mxu0 %v432_v51  ;;  %v462_v56 = vld [vmem:[#allocation5 + $0x520] sm:$0xff]  ;;  %v317_v36 = vld [vmem:[#allocation5 + $0x98] sm:$0xff] }
  0x77   : > { %v492_v54 = vld [vmem:[#allocation5 + $0x610] sm:$0xff]  ;;  %684 = vmatpush.msrb.mxu1 %v464_v52  ;;  %725 = vmatpush.msrb.mxu3 %v526_v53  ;;  %v490_v58 = vld [vmem:[#allocation5 + $0x600] sm:$0xff]  ;;  %v345_v37 = vld [vmem:[#allocation5 + $0x178] sm:$0xff] }
  0x78   : > { %v524_v57 = vld [vmem:[#allocation5 + $0x710] sm:$0xff]  ;;  %706 = vmatpush.msrb.mxu2 %v492_v54  ;;  %665 = vmatpush.msrb.mxu0 %v430_v55  ;;  %v1582_v60 = vld [vmem:[%s1567_s11 + $0x10] sm:$0xff]  ;;  %v1594_v7 = vld [vmem:[%s1567_s11 + $0x8] sm:$0xff] }
  0x79   : > { %v428_v59 = vld [vmem:[#allocation5 + $0x410] sm:$0xff]  ;;  %685 = vmatpush.msrb.mxu1 %v462_v56  ;;  %726 = vmatpush.msrb.mxu3 %v524_v57  ;;  %v522_v63 = vld [vmem:[#allocation5 + $0x700] sm:$0xff]  ;;  %v379_v38 = vld [vmem:[#allocation5 + $0x288] sm:$0xff] }
  0x7a   : > { %v460_v61 = vld [vmem:[#allocation5 + $0x510] sm:$0xff]  ;;  %707 = vmatpush.msrb.mxu2 %v490_v58  ;;  %666 = vmatpush.msrb.mxu0 %v428_v59  ;;  %v426_v2 = vld [vmem:[#allocation5 + $0x400] sm:$0xff]  ;;  %v419_v39 = vld [vmem:[#allocation5 + $0x3c8] sm:$0xff] }
  0x7b   : > { %v1585_v0 = vld [vmem:[%s1567_s11] sm:$0xff]  ;;  %v1588_v1 = vld [vmem:[%s1567_s11 + $0x18] sm:$0xff]  ;;  %628 = vmatmul.f32.vlgmr.msra.gmra.mxu2 %v1582_v60  ;;  %686 = vmatpush.msrb.mxu1 %v460_v61  ;;  %v458_v5 = vld [vmem:[#allocation5 + $0x500] sm:$0xff] }
  0x7c   : > { %772 = vmatpush.msra.mxu2 %v361_v62  ;;  %727 = vmatpush.msrb.mxu3 %v522_v63  ;;  %v560_v6 = vld [vmem:[#allocation5 + $0x830] sm:$0xff]  ;;  %v558_v11 = vld [vmem:[#allocation5 + $0x820] sm:$0xff]  ;;  %v315_v41 = vld [vmem:[#allocation5 + $0x88] sm:$0xff] }
  0x7d   : > { %588 = vmatmul.f32.vlgmr.msra.gmra.mxu0 %v1585_v0  ;;  %648 = vmatmul.f32.vlgmr.msra.gmra.mxu3 %v1588_v1  ;;  %v556_v15 = vld [vmem:[#allocation5 + $0x810] sm:$0xff]  ;;  %v1598_v16 = vld [vmem:[%s1567_s11 + $0x30] sm:$0xff]  ;;  %v1609_v27 = vld [vmem:[%s1567_s11 + $0x28] sm:$0xff] }
  0x7e   : > { %667 = vmatpush.msrb.mxu0 %v426_v2  ;;  %773 = vmatpush.msra.mxu2 %v359_v3  ;;  %v554_v20 = vld [vmem:[#allocation5 + $0x800] sm:$0xff]  ;;  %v1601_v21 = vld [vmem:[%s1567_s11 + $0x38] sm:$0xff]  ;;  %v1605_v22 = vld [vmem:[%s1567_s11 + $0x20] sm:$0xff] }
  0x7f   : > { %792 = vmatpush.msra.mxu3 %v393_v4  ;;  %687 = vmatpush.msrb.mxu1 %v458_v5  ;;  %v1614_v40 = vld [vmem:[%s1567_s11 + $0x40] sm:$0xff]  ;;  %v343_v42 = vld [vmem:[#allocation5 + $0x168] sm:$0xff] }
  0x80   : > { %744 = vmatpush.msra.mxu0 %v560_v6  ;;  %608 = vmatmul.f32.vlgmr.msra.gmra.mxu1 %v1594_v7  ;;  %v377_v43 = vld [vmem:[#allocation5 + $0x278] sm:$0xff]  ;;  %v375_v47 = vld [vmem:[#allocation5 + $0x268] sm:$0xff] }
  0x81   : > { %752 = vmatpush.msra.mxu1 %v329_v8  ;;  %774 = vmatpush.msra.mxu2 %v357_v9  ;;  %v417_v44 = vld [vmem:[#allocation5 + $0x3b8] sm:$0xff]  ;;  %v415_v48 = vld [vmem:[#allocation5 + $0x3a8] sm:$0xff] }
  0x82   : > { %793 = vmatpush.msra.mxu3 %v391_v10  ;;  %745 = vmatpush.msra.mxu0 %v558_v11  ;;  %v313_v45 = vld [vmem:[#allocation5 + $0x78] sm:$0xff]  ;;  %v311_v49 = vld [vmem:[#allocation5 + $0x68] sm:$0xff] }
  0x83   : > { %753 = vmatpush.msra.mxu1 %v327_v12  ;;  %775 = vmatpush.msra.mxu2 %v355_v13  ;;  %v341_v46 = vld [vmem:[#allocation5 + $0x158] sm:$0xff]  ;;  %v339_v50 = vld [vmem:[#allocation5 + $0x148] sm:$0xff] }
  0x84   : > { %794 = vmatpush.msra.mxu3 %v389_v14  ;;  %746 = vmatpush.msra.mxu0 %v556_v15  ;;  %v373_v51 = vld [vmem:[#allocation5 + $0x258] sm:$0xff]  ;;  %v371_v55 = vld [vmem:[#allocation5 + $0x248] sm:$0xff] }
  0x85   : > { %708 = vmatmul.f32.vlgmr.msrb.gmra.mxu2 %v1598_v16  ;;  %754 = vmatpush.msra.mxu1 %v325_v17  ;;  %v413_v52 = vld [vmem:[#allocation5 + $0x398] sm:$0xff]  ;;  %v411_v56 = vld [vmem:[#allocation5 + $0x388] sm:$0xff] }
  0x86   : > { %776 = vmatpush.msra.mxu2 %v353_v18  ;;  %795 = vmatpush.msra.mxu3 %v387_v19  ;;  %v309_v53 = vld [vmem:[#allocation5 + $0x58] sm:$0xff]  ;;  %v307_v57 = vld [vmem:[#allocation5 + $0x48] sm:$0xff] }
  0x87   : > { %747 = vmatpush.msra.mxu0 %v554_v20  ;;  %728 = vmatmul.f32.vlgmr.msrb.gmra.mxu3 %v1601_v21  ;;  %v337_v54 = vld [vmem:[#allocation5 + $0x138] sm:$0xff]  ;;  %v335_v58 = vld [vmem:[#allocation5 + $0x128] sm:$0xff] }
  0x88   : > { %668 = vmatmul.f32.vlgmr.msrb.gmra.mxu0 %v1605_v22  ;;  %755 = vmatpush.msra.mxu1 %v323_v23  ;;  %v369_v59 = vld [vmem:[#allocation5 + $0x238] sm:$0xff]  ;;  %v367_v2 = vld [vmem:[#allocation5 + $0x228] sm:$0xff] }
  0x89   : > { %777 = vmatpush.msra.mxu2 %v351_v24  ;;  %796 = vmatpush.msra.mxu3 %v385_v25  ;;  %v409_v61 = vld [vmem:[#allocation5 + $0x378] sm:$0xff]  ;;  %v407_v3 = vld [vmem:[#allocation5 + $0x368] sm:$0xff] }
  0x8a   : > { %812 = vmatpush.msrb.mxu0 %v425_v26  ;;  %688 = vmatmul.f32.vlgmr.msrb.gmra.mxu1 %v1609_v27  ;;  %v305_v62 = vld [vmem:[#allocation5 + $0x38] sm:$0xff]  ;;  %v303_v4 = vld [vmem:[#allocation5 + $0x28] sm:$0xff] }
  0x8b   : > { %756 = vmatpush.msra.mxu1 %v321_v28  ;;  %778 = vmatpush.msra.mxu2 %v349_v29  ;;  %v333_v63 = vld [vmem:[#allocation5 + $0x118] sm:$0xff]  ;;  %v331_v5 = vld [vmem:[#allocation5 + $0x108] sm:$0xff] }
  0x8c   : > { %797 = vmatpush.msra.mxu3 %v383_v30  ;;  %813 = vmatpush.msrb.mxu0 %v423_v31  ;;  %v365_v6 = vld [vmem:[#allocation5 + $0x218] sm:$0xff]  ;;  %v363_v11 = vld [vmem:[#allocation5 + $0x208] sm:$0xff] }
  0x8d   : > { %757 = vmatpush.msra.mxu1 %v319_v32  ;;  %779 = vmatpush.msra.mxu2 %v347_v33  ;;  %v405_v8 = vld [vmem:[#allocation5 + $0x358] sm:$0xff]  ;;  %v403_v12 = vld [vmem:[#allocation5 + $0x348] sm:$0xff] }
  0x8e   : > { %798 = vmatpush.msra.mxu3 %v381_v34  ;;  %814 = vmatpush.msrb.mxu0 %v421_v35  ;;  %v489_v9 = vld [vmem:[#allocation5 + $0x5f8] sm:$0xff]  ;;  %v487_v13 = vld [vmem:[#allocation5 + $0x5e8] sm:$0xff] }
  0x8f   : > { %758 = vmatpush.msra.mxu1 %v317_v36  ;;  %780 = vmatpush.msra.mxu2 %v345_v37  ;;  %v301_v10 = vld [vmem:[#allocation5 + $0x18] sm:$0xff]  ;;  %v299_v15 = vld [vmem:[#allocation5 + $0x8] sm:$0xff] }
  0x90   : > { %799 = vmatpush.msra.mxu3 %v379_v38  ;;  %815 = vmatpush.msrb.mxu0 %v419_v39  ;;  %v521_v14 = vld [vmem:[#allocation5 + $0x6f8] sm:$0xff]  ;;  %v519_v20 = vld [vmem:[#allocation5 + $0x6e8] sm:$0xff] }
  0x91   : > { %1136 = vmatmul.msk.f32.vlgmr.msra.gmra.mxu0 %vm568_vm0, %v1614_v40  ;;  %759 = vmatpush.msra.mxu1 %v315_v41  ;;  %v401_v17 = vld [vmem:[#allocation5 + $0x338] sm:$0xff]  ;;  %v399_v23 = vld [vmem:[#allocation5 + $0x328] sm:$0xff] }
  0x92   : > { %781 = vmatpush.msra.mxu2 %v343_v42  ;;  %800 = vmatpush.msra.mxu3 %v377_v43  ;;  %v457_v18 = vld [vmem:[#allocation5 + $0x4f8] sm:$0xff]  ;;  %v455_v24 = vld [vmem:[#allocation5 + $0x4e8] sm:$0xff] }
  0x93   : > { %816 = vmatpush.msrb.mxu0 %v417_v44  ;;  %760 = vmatpush.msra.mxu1 %v313_v45  ;;  %v485_v19 = vld [vmem:[#allocation5 + $0x5d8] sm:$0xff]  ;;  %v483_v25 = vld [vmem:[#allocation5 + $0x5c8] sm:$0xff] }
  0x94   : > { %782 = vmatpush.msra.mxu2 %v341_v46  ;;  %801 = vmatpush.msra.mxu3 %v375_v47  ;;  %v517_v26 = vld [vmem:[#allocation5 + $0x6d8] sm:$0xff]  ;;  %v515_v31 = vld [vmem:[#allocation5 + $0x6c8] sm:$0xff] }
  0x95   : > { %817 = vmatpush.msrb.mxu0 %v415_v48  ;;  %761 = vmatpush.msra.mxu1 %v311_v49  ;;  %v397_v28 = vld [vmem:[#allocation5 + $0x318] sm:$0xff]  ;;  %v395_v32 = vld [vmem:[#allocation5 + $0x308] sm:$0xff] }
  0x96   : > { %783 = vmatpush.msra.mxu2 %v339_v50  ;;  %802 = vmatpush.msra.mxu3 %v373_v51  ;;  %v453_v29 = vld [vmem:[#allocation5 + $0x4d8] sm:$0xff]  ;;  %v451_v33 = vld [vmem:[#allocation5 + $0x4c8] sm:$0xff] }
  0x97   : > { %818 = vmatpush.msrb.mxu0 %v413_v52  ;;  %762 = vmatpush.msra.mxu1 %v309_v53  ;;  %v481_v30 = vld [vmem:[#allocation5 + $0x5b8] sm:$0xff]  ;;  %v479_v34 = vld [vmem:[#allocation5 + $0x5a8] sm:$0xff] }
  0x98   : > { %784 = vmatpush.msra.mxu2 %v337_v54  ;;  %803 = vmatpush.msra.mxu3 %v371_v55  ;;  %v513_v35 = vld [vmem:[#allocation5 + $0x6b8] sm:$0xff]  ;;  %v511_v39 = vld [vmem:[#allocation5 + $0x6a8] sm:$0xff] }
  0x99   : > { %819 = vmatpush.msrb.mxu0 %v411_v56  ;;  %763 = vmatpush.msra.mxu1 %v307_v57  ;;  %v553_v36 = vld [vmem:[#allocation5 + $0x7f8] sm:$0xff]  ;;  %v551_v41 = vld [vmem:[#allocation5 + $0x7e8] sm:$0xff] }
  0x9a   : > { %785 = vmatpush.msra.mxu2 %v335_v58  ;;  %804 = vmatpush.msra.mxu3 %v369_v59  ;;  %v449_v37 = vld [vmem:[#allocation5 + $0x4b8] sm:$0xff]  ;;  %v447_v42 = vld [vmem:[#allocation5 + $0x4a8] sm:$0xff] }
  0x9b   : > { %820 = vmatpush.msrb.mxu0 %v409_v61  ;;  %764 = vmatpush.msra.mxu1 %v305_v62  ;;  %v477_v38 = vld [vmem:[#allocation5 + $0x598] sm:$0xff]  ;;  %v475_v43 = vld [vmem:[#allocation5 + $0x588] sm:$0xff] }
  0x9c   : > { %786 = vmatpush.msra.mxu2 %v333_v63  ;;  %805 = vmatpush.msra.mxu3 %v367_v2  ;;  %v509_v44 = vld [vmem:[#allocation5 + $0x698] sm:$0xff]  ;;  %v507_v48 = vld [vmem:[#allocation5 + $0x688] sm:$0xff] }
  0x9d   : > { %821 = vmatpush.msrb.mxu0 %v407_v3  ;;  %765 = vmatpush.msra.mxu1 %v303_v4  ;;  %v549_v45 = vld [vmem:[#allocation5 + $0x7d8] sm:$0xff]  ;;  %v547_v49 = vld [vmem:[#allocation5 + $0x7c8] sm:$0xff] }
  0x9e   : > { %787 = vmatpush.msra.mxu2 %v331_v5  ;;  %806 = vmatpush.msra.mxu3 %v365_v6  ;;  %v445_v46 = vld [vmem:[#allocation5 + $0x498] sm:$0xff]  ;;  %v443_v50 = vld [vmem:[#allocation5 + $0x488] sm:$0xff] }
  0x9f   : > { %822 = vmatpush.msrb.mxu0 %v405_v8  ;;  %766 = vmatpush.msra.mxu1 %v301_v10  ;;  %v473_v47 = vld [vmem:[#allocation5 + $0x578] sm:$0xff]  ;;  %v471_v51 = vld [vmem:[#allocation5 + $0x568] sm:$0xff] }
  0xa0   : > { %852 = vmatpush.msrb.mxu2 %v489_v9  ;;  %807 = vmatpush.msra.mxu3 %v363_v11  ;;  %v505_v52 = vld [vmem:[#allocation5 + $0x678] sm:$0xff]  ;;  %v503_v56 = vld [vmem:[#allocation5 + $0x668] sm:$0xff] }
  0xa1   : > { %823 = vmatpush.msrb.mxu0 %v403_v12  ;;  %767 = vmatpush.msra.mxu1 %v299_v15  ;;  %v545_v53 = vld [vmem:[#allocation5 + $0x7b8] sm:$0xff]  ;;  %v543_v57 = vld [vmem:[#allocation5 + $0x7a8] sm:$0xff] }
  0xa2   : > { %853 = vmatpush.msrb.mxu2 %v487_v13  ;;  %872 = vmatpush.msrb.mxu3 %v521_v14  ;;  %v441_v54 = vld [vmem:[#allocation5 + $0x478] sm:$0xff]  ;;  %v439_v58 = vld [vmem:[#allocation5 + $0x468] sm:$0xff] }
  0xa3   : > { %824 = vmatpush.msrb.mxu0 %v401_v17  ;;  %832 = vmatpush.msrb.mxu1 %v457_v18  ;;  %v469_v55 = vld [vmem:[#allocation5 + $0x558] sm:$0xff]  ;;  %v467_v59 = vld [vmem:[#allocation5 + $0x548] sm:$0xff] }
  0xa4   : > { %854 = vmatpush.msrb.mxu2 %v485_v19  ;;  %873 = vmatpush.msrb.mxu3 %v519_v20  ;;  %v501_v61 = vld [vmem:[#allocation5 + $0x658] sm:$0xff]  ;;  %v499_v3 = vld [vmem:[#allocation5 + $0x648] sm:$0xff] }
  0xa5   : > { %825 = vmatpush.msrb.mxu0 %v399_v23  ;;  %833 = vmatpush.msrb.mxu1 %v455_v24  ;;  %v541_v62 = vld [vmem:[#allocation5 + $0x798] sm:$0xff]  ;;  %v539_v4 = vld [vmem:[#allocation5 + $0x788] sm:$0xff] }
  0xa6   : > { %855 = vmatpush.msrb.mxu2 %v483_v25  ;;  %874 = vmatpush.msrb.mxu3 %v517_v26  ;;  %v437_v63 = vld [vmem:[#allocation5 + $0x458] sm:$0xff]  ;;  %v435_v5 = vld [vmem:[#allocation5 + $0x448] sm:$0xff] }
  0xa7   : > { %826 = vmatpush.msrb.mxu0 %v397_v28  ;;  %834 = vmatpush.msrb.mxu1 %v453_v29  ;;  %v465_v2 = vld [vmem:[#allocation5 + $0x538] sm:$0xff]  ;;  %v463_v6 = vld [vmem:[#allocation5 + $0x528] sm:$0xff] }
  0xa8   : > { %856 = vmatpush.msrb.mxu2 %v481_v30  ;;  %875 = vmatpush.msrb.mxu3 %v515_v31  ;;  %v497_v8 = vld [vmem:[#allocation5 + $0x638] sm:$0xff]  ;;  %v495_v12 = vld [vmem:[#allocation5 + $0x628] sm:$0xff]  ;;  %v944_v30 = vld [vmem:[%s1762_s3 + $0x60] sm:$0xff] }
  0xa9   : > { %827 = vmatpush.msrb.mxu0 %v395_v32  ;;  %835 = vmatpush.msrb.mxu1 %v451_v33  ;;  %v537_v9 = vld [vmem:[#allocation5 + $0x778] sm:$0xff]  ;;  %v535_v13 = vld [vmem:[#allocation5 + $0x768] sm:$0xff]  ;;  %v942_v32 = vld [vmem:[%s1762_s3 + $0x50] sm:$0xff] }
  0xaa   : > { %857 = vmatpush.msrb.mxu2 %v479_v34  ;;  %876 = vmatpush.msrb.mxu3 %v513_v35  ;;  %v433_v10 = vld [vmem:[#allocation5 + $0x438] sm:$0xff]  ;;  %v459_v14 = vld [vmem:[#allocation5 + $0x508] sm:$0xff] }
  0xab   : > { %892 = vmatpush.msra.mxu0 %v553_v36  ;;  %836 = vmatpush.msrb.mxu1 %v449_v37  ;;  %v461_v11 = vld [vmem:[#allocation5 + $0x518] sm:$0xff]  ;;  %v531_v19 = vld [vmem:[#allocation5 + $0x748] sm:$0xff]  ;;  %v936_v36 = vld [vmem:[%s1762_s3 + $0x20] sm:$0xff] }
  0xac   : > { %858 = vmatpush.msrb.mxu2 %v477_v38  ;;  %877 = vmatpush.msrb.mxu3 %v511_v39  ;;  %v493_v15 = vld [vmem:[#allocation5 + $0x618] sm:$0xff]  ;;  %v427_v20 = vld [vmem:[#allocation5 + $0x408] sm:$0xff]  ;;  %v934_v38 = vld [vmem:[%s1762_s3 + $0x10] sm:$0xff] }
  0xad   : > { %893 = vmatpush.msra.mxu0 %v551_v41  ;;  %837 = vmatpush.msrb.mxu1 %v447_v42  ;;  %v533_v17 = vld [vmem:[#allocation5 + $0x758] sm:$0xff]  ;;  %v947_v23 = vld [vmem:[%s1762_s3 + $0x78] sm:$0xff]  ;;  %v932_v41 = vld [vmem:[%s1762_s3] sm:$0xff] }
  0xae   : > { %859 = vmatpush.msrb.mxu2 %v475_v43  ;;  %878 = vmatpush.msrb.mxu3 %v509_v44  ;;  %v429_v18 = vld [vmem:[#allocation5 + $0x418] sm:$0xff]  ;;  %v527_v25 = vld [vmem:[#allocation5 + $0x728] sm:$0xff]  ;;  %v962_v43 = vld [vmem:[%s1762_s3 + $0xf0] sm:$0xff] }
  0xaf   : > { %894 = vmatpush.msra.mxu0 %v549_v45  ;;  %838 = vmatpush.msrb.mxu1 %v445_v46  ;;  %v561_v24 = vld [vmem:[#allocation5 + $0x838] sm:$0xff]  ;;  %v559_v26 = vld [vmem:[#allocation5 + $0x828] sm:$0xff]  ;;  %v562_v45 = vld [vmem:[#allocation7] sm:$0x3] }
  0xb0   : > { %860 = vmatpush.msrb.mxu2 %v473_v47  ;;  %879 = vmatpush.msrb.mxu3 %v507_v48  ;;  %v525_v28 = vld [vmem:[#allocation5 + $0x718] sm:$0xff]  ;;  %v523_v29 = vld [vmem:[#allocation5 + $0x708] sm:$0xff]  ;;  %v960_v46 = vld [vmem:[%s1762_s3 + $0xe0] sm:$0xff]  ;;  %v564_v47 = vperm.slane %v562_v45, 0 }
  0xb1   : > { %895 = vmatpush.msra.mxu0 %v547_v49  ;;  %839 = vmatpush.msrb.mxu1 %v443_v50  ;;  %v555_v31 = vld [vmem:[#allocation5 + $0x808] sm:$0xff]  ;;  %v941_v33 = vld [vmem:[%s1762_s3 + $0x48] sm:$0xff]  ;;  %v958_v49 = vld [vmem:[%s1762_s3 + $0xd0] sm:$0xff] }
  0xb2   : > { %861 = vmatpush.msrb.mxu2 %v471_v51  ;;  %880 = vmatpush.msrb.mxu3 %v505_v52  ;;  %v939_v34 = vld [vmem:[%s1762_s3 + $0x38] sm:$0xff]  ;;  %v937_v35 = vld [vmem:[%s1762_s3 + $0x28] sm:$0xff] }
  0xb3   : > { %896 = vmatpush.msra.mxu0 %v545_v53  ;;  %840 = vmatpush.msrb.mxu1 %v441_v54  ;;  %v935_v37 = vld [vmem:[%s1762_s3 + $0x18] sm:$0xff]  ;;  %v933_v39 = vld [vmem:[%s1762_s3 + $0x8] sm:$0xff] }
  0xb4   : > { %862 = vmatpush.msrb.mxu2 %v469_v55  ;;  %881 = vmatpush.msrb.mxu3 %v503_v56  ;;  %v963_v42 = vld [vmem:[%s1762_s3 + $0xf8] sm:$0xff]  ;;  %v961_v44 = vld [vmem:[%s1762_s3 + $0xe8] sm:$0xff] }
  0xb5   : > { %897 = vmatpush.msra.mxu0 %v543_v57  ;;  %841 = vmatpush.msrb.mxu1 %v439_v58  ;;  %v959_v48 = vld [vmem:[%s1762_s3 + $0xd8] sm:$0xff] }
  0xb6   : > { %863 = vmatpush.msrb.mxu2 %v467_v59  ;;  %882 = vmatpush.msrb.mxu3 %v501_v61 }
  0xb7   : > { %898 = vmatpush.msra.mxu0 %v541_v62  ;;  %788 = vmatmul.f32.vlgmr.msra.gmra.mxu2 %v1594_v7  ;;  %v431_v7 = vld [vmem:[#allocation5 + $0x428] sm:$0xff] }
  0xb8   : > { %842 = vmatpush.msrb.mxu1 %v437_v63  ;;  %864 = vmatpush.msrb.mxu2 %v465_v2 }
  0xb9   : > { %883 = vmatpush.msrb.mxu3 %v499_v3  ;;  %899 = vmatpush.msra.mxu0 %v539_v4 }
  0xba   : > { %808 = vmatmul.f32.vlgmr.msra.gmra.mxu3 %v1582_v60  ;;  %843 = vmatpush.msrb.mxu1 %v435_v5  ;;  %v491_v60 = vld [vmem:[#allocation5 + $0x608] sm:$0xff] }
  0xbb   : > { %865 = vmatpush.msrb.mxu2 %v463_v6  ;;  %884 = vmatpush.msrb.mxu3 %v497_v8  ;;  %v957_v8 = vld [vmem:[%s1762_s3 + $0xc8] sm:$0xff] }
  0xbc   : > { %900 = vmatpush.msra.mxu0 %v537_v9  ;;  %768 = vmatmul.f32.vlgmr.msra.gmra.mxu1 %v1585_v0  ;;  %v529_v0 = vld [vmem:[#allocation5 + $0x738] sm:$0xff]  ;;  %v956_v9 = vld [vmem:[%s1762_s3 + $0xc0] sm:$0xff] }
  0xbd   : > { %844 = vmatpush.msrb.mxu1 %v433_v10  ;;  %866 = vmatpush.msrb.mxu2 %v461_v11  ;;  %v955_v10 = vld [vmem:[%s1762_s3 + $0xb8] sm:$0xff]  ;;  %v954_v11 = vld [vmem:[%s1762_s3 + $0xb0] sm:$0xff] }
  0xbe   : > { %885 = vmatpush.msrb.mxu3 %v495_v12  ;;  %901 = vmatpush.msra.mxu0 %v535_v13  ;;  %v953_v12 = vld [vmem:[%s1762_s3 + $0xa8] sm:$0xff]  ;;  %v952_v13 = vld [vmem:[%s1762_s3 + $0xa0] sm:$0xff] }
  0xbf   : > { %845 = vmatpush.msrb.mxu1 %v431_v7  ;;  %867 = vmatpush.msrb.mxu2 %v459_v14  ;;  %v951_v7 = vld [vmem:[%s1762_s3 + $0x98] sm:$0xff]  ;;  %v950_v14 = vld [vmem:[%s1762_s3 + $0x90] sm:$0xff] }
  0xc0   : > { %886 = vmatpush.msrb.mxu3 %v493_v15  ;;  %902 = vmatpush.msra.mxu0 %v533_v17  ;;  %v949_v15 = vld [vmem:[%s1762_s3 + $0x88] sm:$0xff]  ;;  %v948_v17 = vld [vmem:[%s1762_s3 + $0x80] sm:$0xff] }
  0xc1   : > { %868 = vmatmul.f32.vlgmr.msrb.gmra.mxu2 %v1609_v27  ;;  %846 = vmatpush.msrb.mxu1 %v429_v18  ;;  %v946_v27 = vld [vmem:[%s1762_s3 + $0x70] sm:$0xff]  ;;  %v565_v18 = vperm.slane %v562_v45, 1 }
  0xc2   : > { %887 = vmatpush.msrb.mxu3 %v491_v60  ;;  %903 = vmatpush.msra.mxu0 %v531_v19 }
  0xc3   : > { %828 = vmatmul.f32.vlgmr.msrb.gmra.mxu0 %v1588_v1  ;;  %888 = vmatmul.f32.vlgmr.msrb.gmra.mxu3 %v1598_v16  ;;  %v945_v1 = vld [vmem:[%s1762_s3 + $0x68] sm:$0xff] }
  0xc4   : > { %847 = vmatpush.msrb.mxu1 %v427_v20  ;;  %904 = vmatpush.msra.mxu0 %v529_v0  ;;  %v557_v16 = vld [vmem:[#allocation5 + $0x818] sm:$0xff] }
  0xc5   : > { %848 = vmatmul.f32.vlgmr.msrb.gmra.mxu1 %v1605_v22  ;;  %968 = vmatpush.msra.mxu2 %v947_v23  ;;  %v943_v22 = vld [vmem:[%s1762_s3 + $0x58] sm:$0xff] }
  0xc6   : > { %924 = vmatpush.msra.mxu1 %v561_v24  ;;  %905 = vmatpush.msra.mxu0 %v527_v25 }
  0xc7   : > { %969 = vmatpush.msra.mxu2 %v946_v27  ;;  %988 = vmatpush.msra.mxu3 %v963_v42 }
  0xc8   : > { %925 = vmatpush.msra.mxu1 %v559_v26  ;;  %906 = vmatpush.msra.mxu0 %v525_v28 }
  0xc9   : > { %970 = vmatpush.msra.mxu2 %v945_v1  ;;  %989 = vmatpush.msra.mxu3 %v962_v43 }
  0xca   : > { %926 = vmatpush.msra.mxu1 %v557_v16  ;;  %907 = vmatpush.msra.mxu0 %v523_v29 }
  0xcb   : > { %908 = vmatmul.f32.vlgmr.msra.gmra.mxu0 %v1601_v21  ;;  %971 = vmatpush.msra.mxu2 %v944_v30  ;;  %v940_v21 = vld [vmem:[%s1762_s3 + $0x40] sm:$0xff] }
  0xcc   : > { %927 = vmatpush.msra.mxu1 %v555_v31  ;;  %990 = vmatpush.msra.mxu3 %v961_v44 }
  0xcd   : > { %1137 = vmatmul.msk.f32.vlgmr.msra.gmra.mxu1 %vm568_vm0, %v1614_v40  ;;  %972 = vmatpush.msra.mxu2 %v943_v22  ;;  %v938_v40 = vld [vmem:[%s1762_s3 + $0x30] sm:$0xff] }
  0xce   : > { %991 = vmatpush.msra.mxu3 %v960_v46 }
  0xcf   : > { %973 = vmatpush.msra.mxu2 %v942_v32 }
  0xd0   : > { %992 = vmatpush.msra.mxu3 %v959_v48 }
  0xd1   : > { %974 = vmatpush.msra.mxu2 %v941_v33 }
  0xd2   : > { %993 = vmatpush.msra.mxu3 %v958_v49 }
  0xd3   : > { %975 = vmatpush.msra.mxu2 %v940_v21  ;;  %v1224_v21 = vld [vmem:[#allocation8] ss:$0 sm:$0xff] }
  0xd4   : > { %994 = vmatpush.msra.mxu3 %v957_v8 }
  0xd5   : > { %976 = vmatpush.msra.mxu2 %v939_v34 }
  0xd6   : > { %995 = vmatpush.msra.mxu3 %v956_v9 }
  0xd7   : > { %977 = vmatpush.msra.mxu2 %v938_v40 }
  0xd8   : > { %996 = vmatpush.msra.mxu3 %v955_v10 }
  0xd9   : > { %978 = vmatpush.msra.mxu2 %v937_v35 }
  0xda   : > { %997 = vmatpush.msra.mxu3 %v954_v11 }
  0xdb   : > { %979 = vmatpush.msra.mxu2 %v936_v36 }
  0xdc   : > { %998 = vmatpush.msra.mxu3 %v953_v12 }
  0xdd   : > { %980 = vmatpush.msra.mxu2 %v935_v37 }
  0xde   : > { %999 = vmatpush.msra.mxu3 %v952_v13 }
  0xdf   : > { %981 = vmatpush.msra.mxu2 %v934_v38 }
  0xe0   : > { %1000 = vmatpush.msra.mxu3 %v951_v7 }
  0xe1   : > { %982 = vmatpush.msra.mxu2 %v933_v39 }
  0xe2   : > { %1001 = vmatpush.msra.mxu3 %v950_v14 }
  0xe3   : > { %983 = vmatpush.msra.mxu2 %v932_v41 }
  0xe4   : > { %1002 = vmatpush.msra.mxu3 %v949_v15 }
  0xe6   : > { %1003 = vmatpush.msra.mxu3 %v948_v17 }
  0xfa   : > { %v589_v50 = vpop.f32.mrf.mxu0 }
  0xfb   : > { %v590_v51 = vadd.f32 %v589_v50, %v564_v47 }
  0xfd   : > { %v609_v52 = vpop.f32.mrf.mxu1 }
  0xfe   : > { %v610_v53 = vadd.f32 %v609_v52, %v590_v51  ;;  %v629_v54 = vpop.f32.mrf.mxu2 }
 0x100   : > { %v630_v55 = vadd.f32 %v629_v54, %v610_v53  ;;  %v649_v56 = vpop.f32.mrf.mxu3 }
 0x102   : > { %v650_v57 = vadd.f32 %v649_v56, %v630_v55 }
 0x105   : > { %v669_v58 = vpop.f32.mrf.mxu0 }
 0x106   : > { %v670_v59 = vadd.f32 %v669_v58, %v650_v57 }
 0x107   : > { %v689_v61 = vpop.f32.mrf.mxu1 }
 0x108   : > { %v690_v62 = vadd.f32 %v689_v61, %v670_v59  ;;  %v709_v63 = vpop.f32.mrf.mxu2 }
 0x10a   : > { %v710_v2 = vadd.f32 %v709_v63, %v690_v62  ;;  %v729_v3 = vpop.f32.mrf.mxu3 }
 0x10c   : > { %v730_v4 = vadd.f32 %v729_v3, %v710_v2 }
 0x10e   : > { %v749_v5 = vpop.f32.mrf.mxu0 }
 0x10f   : > { %v750_v6 = vadd.f32 %v749_v5, %v730_v4 }
 0x111   : > { %984 = vmatmul.f32.vlgmr.msra.gmra.mxu2 %v750_v6 }
 0x139   : > { %v769_v60 = vpop.f32.mrf.mxu1 }
 0x13a   : > { %v770_v19 = vadd.f32 %v769_v60, %v565_v18  ;;  %v789_v20 = vpop.f32.mrf.mxu2 }
 0x13c   : > { %v790_v0 = vadd.f32 %v789_v20, %v770_v19 }
 0x13d   : > { %v809_v23 = vpop.f32.mrf.mxu3 }
 0x13e   : > { %v810_v24 = vadd.f32 %v809_v23, %v790_v0 }
 0x140   : > { %v829_v25 = vpop.f32.mrf.mxu0 }
 0x141   : > { %v830_v27 = vadd.f32 %v829_v25, %v810_v24 }
 0x142   : > { %v849_v26 = vpop.f32.mrf.mxu1 }
 0x143   : > { %v850_v28 = vadd.f32 %v849_v26, %v830_v27 }
 0x144   : > { %v869_v1 = vpop.f32.mrf.mxu2 }
 0x145   : > { %v870_v16 = vadd.f32 %v869_v1, %v850_v28 }
 0x146   : > { %v889_v29 = vpop.f32.mrf.mxu3 }
 0x147   : > { %v890_v30 = vadd.f32 %v889_v29, %v870_v16 }
 0x148   : > { %v909_v31 = vpop.f32.mrf.mxu0 }
 0x149   : > { %v910_v22 = vadd.f32 %v909_v31, %v890_v30 }
 0x14a   : > { %v929_v32 = vpop.f32.mrf.mxu1 }
 0x14b   : > { %v930_v33 = vadd.f32 %v929_v32, %v910_v22 }
 0x14d   : > { %1004 = vmatmul.f32.vlgmr.msra.gmra.mxu3 %v930_v33 }
 0x194   : > { %v985_v34 = vpop.f32.mrf.mxu2 }
 0x195   : > { %v986_v40 = vadd.f32 %v1224_v21, %v985_v34 }
 0x1d0   : > { %v1005_v35 = vpop.f32.mrf.mxu3 }
 0x1d1   : > { %v1006_v36 = vadd.f32 %v1005_v35, %v986_v40 }
 0x1d3   : > { %1008 = vst.msk [vmem:[%s288_s26] sm:$0xff] %vm568_vm0, %v1006_v36 }
 0x1d4   : > { %1372 = shalt.err (!%p1369_p9)
}
 0x1d5   : > { %1159 = dma.vmem_to_hbm [thread:$0]  (%p1532_p0), %s1023_s28, 128, %s1025_s8, %s1010_s12  }
 0x1d6 PF: > { %s1036_s30 = sand.u32 1, %s1407_s18   ;;  %p1775_p10 = scmp.ge.s32.totalorder %s1419_s21, 2 }
 0x1d7   : > { %s1037_s24 = scalar_lea.sflag [#allocation4], %s1036_s30 }
 0x1d8   : > { %p1176_p11 = pnand %p1775_p10, %p1538_p6 }
 0x1da   : > { %p1177_p12 = pneg %p1176_p11 }
 0x1dc   : > { %1402 = dma.done.wait (%p1177_p12), %s1037_s24, 128  }
 0x1dd   : > { %1404 = vsyncadd (%p1177_p12), %s1037_s24, 4294967168  ;;  %p20_p2 = scmp.ge.s32.totalorder %s1512_s22, 4   ;;  %s1776_s18 = smov %s1411_s19 }
 0x1de   : > { %s1777_s19 = smov %s1415_s20  ;;  %s1778_s20 = smov %s1524_s27 }
 0x1df   : > { %s1779_s21 = smov %s1512_s22  ;;  %22 = sbr.rel (!%p20_p2) target bundleno = 10 (0xa), region = 97 }
 0x1e4   :  { %1043 = vsyncpa [#allocation3], 1 }
 0x1e5   :  { %1045 = vsyncpa [#allocation3 + $0x1], 1 }
 0x1e6   :  { %1046 = vsyncpa [#allocation6], 1 }
 0x1e7   :  { %1047 = vsyncpa [#allocation9], 1 }
 0x1e8   :  { %1048 = vsyncpa [#allocation4], 1 }
 0x1e9   :  { %1050 = vsyncpa [#allocation4 + $0x1], 1 }

</bundles_post_ra>
